<compile_context>
chip_gen: v7x
topology: tpu7x:2x2x1
jax: 0.10.0
libtpu: 0.0.40
codegen_flags: <defaults>
</compile_context>

<pallas_src>
import functools
import math

import numpy as np
import jax
import jax.numpy as jnp
from jax import lax
from jax.experimental import pallas as pl
from jax.experimental.pallas import tpu as pltpu


def _round_up(x: int, m: int) -> int:
    return ((x + m - 1) // m) * m


def _vq_tile_kernel(x_ref, wt_ref, w_ref, w2_ref,
                    enc_ref, quant_ref, counts_ref, sse_ref,
                    *, total_rows: int):
    """One batch tile: distances -> argmin -> one-hot -> quantize -> partials."""
    tile_b = x_ref.shape[0]
    num_codes = w_ref.shape[0]
    tile_idx = pl.program_id(0)

    x = x_ref[...]                                              # (TB, Dim) f32

    # Distance matmul on the MXU, bf16 inputs / f32 accumulation.
    #   ||x||^2 is a per-row constant -> dropped (argmin-invariant).
    #   ||e||^2 (w2) is precomputed once in the wrapper; wt is the
    #   pre-transposed codebook so this is a plain NN contraction.
    xw = jnp.dot(x.astype(wt_ref.dtype), wt_ref[...],
                 preferred_element_type=jnp.float32)            # (TB, E) f32
    dist = w2_ref[...] - 2.0 * xw                               # (TB, E)

    # argmin along E with first-occurrence tie-break (matches torch.argmin).
    iota_e = lax.broadcasted_iota(jnp.int32, (1, num_codes), 1)  # (1, E)
    min_d = jnp.min(dist, axis=1, keepdims=True)                 # (TB, 1)
    cand = jnp.where(dist == min_d, iota_e, num_codes)           # (TB, E)
    idx = jnp.min(cand, axis=1, keepdims=True)                   # (TB, 1)

    enc = (iota_e == idx).astype(jnp.float32)                    # (TB, E) one-hot
    # Quantize in f32 so outputs are exact codebook rows.
    quant = jnp.dot(enc, w_ref[...],
                    preferred_element_type=jnp.float32)          # (TB, Dim)

    enc_ref[...] = enc
    quant_ref[...] = quant.astype(quant_ref.dtype)

    # Per-tile partial statistics (reduced in the wrapper -> megacore-safe).
    # Mask rows past the true batch size: a partial last tile reads padded
    # (unspecified) VMEM, which must not contaminate the sums.
    row = tile_idx * tile_b + lax.broadcasted_iota(jnp.int32, (tile_b, 1), 0)
    valid = row < total_rows                                     # (TB, 1) bool

    diff = jnp.where(valid, quant - x, 0.0)                      # (TB, Dim)
    sse = jnp.sum(diff * diff, keepdims=True)                    # (1, 1)
    counts = jnp.sum(jnp.where(valid, enc, 0.0),
                     axis=0, keepdims=True)                      # (1, E)

    counts_ref[...] = counts.reshape(1, 1, num_codes)
    sse_ref[...] = jnp.broadcast_to(sse.reshape(1, 1, 1), sse_ref.shape)


def vector_quantizer_forward(inputs, embeddings, commitment_cost,
                             *, tile_b=None, precise_distances=False):
    """Forward pass of VectorQuantizer (hyp.vq_rotate=False path).

    inputs:     (B, C, D, H, W) float array with C*D*H*W == embedding_dim
    embeddings: (num_embeddings, embedding_dim) float array
    Returns (loss, quantized, perplexity, encodings) like the PyTorch module.
    """
    input_shape = inputs.shape
    batch = int(input_shape[0])
    dim = int(math.prod(input_shape[1:]))
    num_codes, emb_dim = embeddings.shape
    assert dim == emb_dim, "C*D*H*W must equal embedding_dim"

    flat = inputs.reshape(batch, dim).astype(jnp.float32)
    w = embeddings.astype(jnp.float32)                        # (E, Dim) for enc @ w
    dist_dtype = jnp.float32 if precise_distances else jnp.bfloat16
    wt = w.T.astype(dist_dtype)                               # (Dim, E) for distances
    w2 = jnp.sum(w * w, axis=1, keepdims=True).T              # (1, E), computed once

    # Batch tile: multiple of 8 sublanes, MXU-friendly, bounded VMEM
    # (tile_b=512 keeps steady-state VMEM use ~10 MiB incl. double buffers,
    #  comfortably inside v7x's 64 MiB as well as v5e/v6e).
    if tile_b is None:
        tile_b = min(512, _round_up(batch, 8))
    tile_b = max(8, _round_up(int(tile_b), 8))
    num_tiles = (batch + tile_b - 1) // tile_b

    kernel = functools.partial(_vq_tile_kernel, total_rows=batch)

    enc, quant_flat, counts_p, sse_p = pl.pallas_call(
        kernel,
        grid=(num_tiles,),
        in_specs=[
            pl.BlockSpec((tile_b, dim), lambda i: (i, 0)),        # x tile
            pl.BlockSpec((dim, num_codes), lambda i: (0, 0)),     # codebook^T (resident)
            pl.BlockSpec((num_codes, dim), lambda i: (0, 0)),     # codebook   (resident)
            pl.BlockSpec((1, num_codes), lambda i: (0, 0)),       # ||e||^2    (resident)
        ],
        out_specs=(
            pl.BlockSpec((tile_b, num_codes), lambda i: (i, 0)),    # encodings
            pl.BlockSpec((tile_b, dim), lambda i: (i, 0)),          # quantized (flat)
            pl.BlockSpec((1, 1, num_codes), lambda i: (i, 0, 0)),   # per-tile code counts
            pl.BlockSpec((1, 1, 128), lambda i: (i, 0, 0)),         # per-tile SSE (lane-dense)
        ),
        out_shape=(
            jax.ShapeDtypeStruct((batch, num_codes), jnp.float32),
            jax.ShapeDtypeStruct((batch, dim), jnp.float32),
            jax.ShapeDtypeStruct((num_tiles, 1, num_codes), jnp.float32),
            jax.ShapeDtypeStruct((num_tiles, 1, 128), jnp.float32),
        ),
        compiler_params=pltpu.CompilerParams(
            dimension_semantics=("parallel",),       # batch tiles are independent
            vmem_limit_bytes=48 * 1024 * 1024,       # explicit, fits v5e/v6e/v7x
        ),
    )(flat, wt, w, w2)

    # Tiny cross-tile reduction (num_tiles scalars + (num_tiles, E)) in plain JAX.
    sse_total = jnp.sum(sse_p[:, 0, 0])
    mse = sse_total / float(batch * dim)
    # forward value of q_latent_loss + commitment_cost * e_latent_loss
    loss = (1.0 + float(commitment_cost)) * mse

    avg_probs = jnp.sum(counts_p[:, 0, :], axis=0) / float(batch)
    perplexity = jnp.exp(-jnp.sum(avg_probs * jnp.log(avg_probs + 1e-10)))

    # straight-through output (forward value == quantized), original shape
    quantized = quant_flat.reshape(input_shape)
    return loss, quantized, perplexity, enc


def _check_case(inputs, embeddings, commitment_cost, **kw):
    """Validate kernel outputs.

    Because the distance matmul may run in bf16 (and the kernel drops the
    row-constant ||x||^2 term), the exact argmin can legitimately differ from
    an f32 reference on near-ties.  So instead of bit-exact comparison we check
    semantics robustly: valid one-hot encodings, quantized == selected codebook
    rows, eps-optimality of the selection under exact (float64) distances, and
    loss / perplexity consistency.
    """
    loss, quantized, perplexity, encodings = jax.block_until_ready(
        vector_quantizer_forward(inputs, embeddings, commitment_cost, **kw))

    batch = inputs.shape[0]
    dim = int(math.prod(inputs.shape[1:]))
    flat = np.asarray(inputs, dtype=np.float64).reshape(batch, dim)
    w = np.asarray(embeddings, dtype=np.float64)
    enc = np.asarray(encodings)
    quant = np.asarray(quantized, dtype=np.float64).reshape(batch, dim)

    # (1) encodings are valid one-hot rows
    assert enc.shape == (batch, w.shape[0])
    assert np.all((enc == 0.0) | (enc == 1.0))
    assert np.all(enc.sum(axis=1) == 1.0)
    idx = np.argmax(enc, axis=1)

    # (2) quantized rows are exactly the selected codebook rows
    np.testing.assert_allclose(quant, w[idx], rtol=1e-6, atol=1e-6)

    # (3) selected codes are (near-)optimal under exact float64 distances
    d = (np.sum(flat ** 2, axis=1, keepdims=True)
         + np.sum(w ** 2, axis=1) - 2.0 * flat @ w.T)            # (B, E)
    min_d = d.min(axis=1)
    chosen_d = d[np.arange(batch), idx]
    assert np.all(chosen_d <= min_d + 1e-2 + 1e-5 * np.abs(min_d))

    # (4) loss == (1+beta) * MSE(quantized, inputs), and matches the
    #     exact-argmin reference loss (near-ties have near-equal distances)
    mse = np.mean((quant - flat) ** 2)
    np.testing.assert_allclose(float(loss), (1.0 + commitment_cost) * mse,
                               rtol=5e-4, atol=1e-6)
    ref_loss = (1.0 + commitment_cost) * np.mean(min_d) / dim
    np.testing.assert_allclose(float(loss), ref_loss, rtol=5e-4, atol=1e-6)

    # (5) perplexity is consistent with the emitted encodings
    avg = enc.astype(np.float64).mean(axis=0)
    ref_perp = np.exp(-np.sum(avg * np.log(avg + 1e-10)))
    np.testing.assert_allclose(float(perplexity), ref_perp, rtol=1e-4, atol=1e-6)


if __name__ == "__main__":
    key = jax.random.PRNGKey(0)
    k_in, k_emb, k_in2 = jax.random.split(key, 3)

    # Small shapes consistent with the module: (B, C, D, H, W), embedding_dim = C*D*H*W.
    C, D, H, W = 4, 4, 4, 4
    embedding_dim = C * D * H * W            # 256
    num_embeddings = 512
    commitment_cost = 0.25

    # Deterministic embedding init: uniform(-1/E, +1/E) like the torch module.
    limit = 1.0 / num_embeddings
    embeddings = jax.random.uniform(
        k_emb, (num_embeddings, embedding_dim),
        minval=-limit, maxval=limit, dtype=jnp.float32)

    # Case 1: tiny batch (B=2), single tile, default bf16 distance matmul.
    inputs_small = jax.random.normal(k_in, (2, C, D, H, W), dtype=jnp.float32)
    _check_case(inputs_small, embeddings, commitment_cost)

    # Case 2: same batch, exact f32 distance path.
    _check_case(inputs_small, embeddings, commitment_cost, precise_distances=True)

    # Case 3: larger batch with an explicit small tile to exercise the
    # multi-tile pipelined grid and the masked partial last tile
    # (300 rows = 128 + 128 + 44).
    inputs_big = jax.random.normal(k_in2, (300, C, D, H, W), dtype=jnp.float32)
    _check_case(inputs_big, embeddings, commitment_cost, tile_b=128)

    print("KERNEL_OK")
</pallas_src>

<mosaic_0001>
module attributes {stable_mosaic.version = 11 : i64} {
  func.func @_vq_tile_kernel(%arg0: i32, %arg1: memref<8x256xf32, #tpu.memory_space<vmem>>, %arg2: memref<256x512xbf16, #tpu.memory_space<vmem>>, %arg3: memref<512x256xf32, #tpu.memory_space<vmem>>, %arg4: memref<1x512xf32, #tpu.memory_space<vmem>>, %arg5: memref<8x512xf32, #tpu.memory_space<vmem>>, %arg6: memref<8x256xf32, #tpu.memory_space<vmem>>, %arg7: memref<1x1x512xf32, #tpu.memory_space<vmem>>, %arg8: memref<1x1x128xf32, #tpu.memory_space<vmem>>) attributes {dimension_semantics = [#tpu.dimension_semantics<parallel>], iteration_bounds = array<i64: 1>, scalar_prefetch = 0 : i64, scratch_operands = 0 : i64, tpu.core_type = #tpu.core_type<tc>, window_params = [{transform_indices = @transform_0, window_bounds = array<i64: 8, 256>}, {pipeline_mode = #tpu.pipeline_mode<synchronous>, transform_indices = @transform_1, window_bounds = array<i64: 256, 512>}, {pipeline_mode = #tpu.pipeline_mode<synchronous>, transform_indices = @transform_2, window_bounds = array<i64: 512, 256>}, {pipeline_mode = #tpu.pipeline_mode<synchronous>, transform_indices = @transform_3, window_bounds = array<i64: 1, 512>}, {transform_indices = @transform_4, window_bounds = array<i64: 8, 512>}, {transform_indices = @transform_5, window_bounds = array<i64: 8, 256>}, {transform_indices = @transform_6, window_bounds = array<i64: 1, 1, 512>}, {transform_indices = @transform_7, window_bounds = array<i64: 1, 1, 128>}]} {
    %c0 = arith.constant 0 : index
    %c0_0 = arith.constant 0 : index
    %0 = vector.load %arg1[%c0, %c0_0] : memref<8x256xf32, #tpu.memory_space<vmem>>, vector<8x256xf32>
    %1 = arith.truncf %0 : vector<8x256xf32> to vector<8x256xbf16>
    %c0_1 = arith.constant 0 : index
    %c0_2 = arith.constant 0 : index
    %2 = vector.load %arg2[%c0_1, %c0_2] : memref<256x512xbf16, #tpu.memory_space<vmem>>, vector<256x512xbf16>
    %cst = arith.constant dense<0.000000e+00> : vector<8x512xf32>
    %3 = tpu.matmul %1, %2, %cst {dimension_numbers = #tpu.dot_dimension_numbers<[1], [0], [0], [1], [0, 0, 1, 1], [], []>} : vector<8x256xbf16>, vector<256x512xbf16>, vector<8x512xf32> -> vector<8x512xf32>
    %c0_3 = arith.constant 0 : index
    %c0_4 = arith.constant 0 : index
    %4 = vector.load %arg4[%c0_3, %c0_4] : memref<1x512xf32, #tpu.memory_space<vmem>>, vector<1x512xf32>
    %cst_5 = arith.constant 2.000000e+00 : f32
    %5 = vector.broadcast %cst_5 : f32 to vector<8x512xf32>
    %6 = arith.mulf %5, %3 : vector<8x512xf32>
    %7 = vector.broadcast %4 : vector<1x512xf32> to vector<8x512xf32>
    %8 = arith.subf %7, %6 : vector<8x512xf32>
    %9 = tpu.iota {dimensions = array<i32: 1>} : vector<1x512xi32>
    %cst_6 = arith.constant dense<0x7F800000> : vector<8xf32>
    %10 = vector.multi_reduction <minimumf>, %8, %cst_6 [1] : vector<8x512xf32> to vector<8xf32>
    %11 = vector.shape_cast %10 : vector<8xf32> to vector<8x1xf32>
    %12 = vector.broadcast %11 : vector<8x1xf32> to vector<8x512xf32>
    %13 = arith.cmpf oeq, %8, %12 : vector<8x512xf32>
    %c512_i32 = arith.constant 512 : i32
    %14 = vector.shape_cast %9 : vector<1x512xi32> to vector<1x512xi32>
    %15 = vector.broadcast %14 : vector<1x512xi32> to vector<8x512xi32>
    %16 = vector.broadcast %c512_i32 : i32 to vector<8x512xi32>
    %17 = arith.select %13, %15, %16 : vector<8x512xi1>, vector<8x512xi32>
    %cst_7 = arith.constant dense<2147483647> : vector<8xi32>
    %18 = vector.multi_reduction <minsi>, %17, %cst_7 [1] : vector<8x512xi32> to vector<8xi32>
    %19 = vector.shape_cast %18 : vector<8xi32> to vector<8x1xi32>
    %20 = vector.broadcast %9 : vector<1x512xi32> to vector<8x512xi32>
    %21 = vector.broadcast %19 : vector<8x1xi32> to vector<8x512xi32>
    %22 = arith.cmpi eq, %20, %21 : vector<8x512xi32>
    %23 = arith.extui %22 : vector<8x512xi1> to vector<8x512xi32>
    %24 = arith.sitofp %23 : vector<8x512xi32> to vector<8x512xf32>
    %c0_8 = arith.constant 0 : index
    %c0_9 = arith.constant 0 : index
    %25 = vector.load %arg3[%c0_8, %c0_9] : memref<512x256xf32, #tpu.memory_space<vmem>>, vector<512x256xf32>
    %cst_10 = arith.constant dense<0.000000e+00> : vector<8x256xf32>
    %26 = tpu.matmul %24, %25, %cst_10 {dimension_numbers = #tpu.dot_dimension_numbers<[1], [0], [0], [1], [0, 0, 1, 1], [], []>} : vector<8x512xf32>, vector<512x256xf32>, vector<8x256xf32> -> vector<8x256xf32>
    %c0_11 = arith.constant 0 : index
    %c0_12 = arith.constant 0 : index
    %27 = vector.load %arg5[%c0_11, %c0_12] : memref<8x512xf32, #tpu.memory_space<vmem>>, vector<8x512xf32>
    tpu.vector_store %arg5[%c0_11, %c0_12], %24 {strides = array<i32>} : memref<8x512xf32, #tpu.memory_space<vmem>>, vector<8x512xf32>,
    %c0_13 = arith.constant 0 : index
    %c0_14 = arith.constant 0 : index
    %28 = vector.load %arg6[%c0_13, %c0_14] : memref<8x256xf32, #tpu.memory_space<vmem>>, vector<8x256xf32>
    tpu.vector_store %arg6[%c0_13, %c0_14], %26 {strides = array<i32>} : memref<8x256xf32, #tpu.memory_space<vmem>>, vector<8x256xf32>,
    %c8_i32 = arith.constant 8 : i32
    %29 = arith.muli %arg0, %c8_i32 : i32
    %30 = tpu.iota {dimensions = array<i32: 0>} : vector<8x1xi32>
    %31 = vector.broadcast %29 : i32 to vector<8x1xi32>
    %32 = arith.addi %31, %30 : vector<8x1xi32>
    %c2_i32 = arith.constant 2 : i32
    %33 = vector.broadcast %c2_i32 : i32 to vector<8x1xi32>
    %34 = arith.cmpi slt, %32, %33 : vector<8x1xi32>
    %35 = arith.subf %26, %0 : vector<8x256xf32>
    %cst_15 = arith.constant 0.000000e+00 : f32
    %36 = vector.shape_cast %34 : vector<8x1xi1> to vector<8x1xi1>
    %37 = vector.broadcast %36 : vector<8x1xi1> to vector<8x256xi1>
    %38 = vector.broadcast %cst_15 : f32 to vector<8x256xf32>
    %39 = arith.select %37, %35, %38 : vector<8x256xi1>, vector<8x256xf32>
    %40 = arith.mulf %39, %39 : vector<8x256xf32>
    %41 = vector.shape_cast %40 : vector<8x256xf32> to vector<1x8x256xf32>
    %cst_16 = arith.constant dense<0.000000e+00> : vector<1xf32>
    %42 = vector.multi_reduction <add>, %41, %cst_16 [1, 2] : vector<1x8x256xf32> to vector<1xf32>
    %43 = vector.shape_cast %42 : vector<1xf32> to vector<1x1x1xf32>
    %44 = vector.extract %43[0, 0, 0] : f32 from vector<1x1x1xf32>
    %45 = vector.broadcast %44 : f32 to vector<1x1xf32>
    %cst_17 = arith.constant 0.000000e+00 : f32
    %46 = vector.shape_cast %34 : vector<8x1xi1> to vector<8x1xi1>
    %47 = vector.broadcast %46 : vector<8x1xi1> to vector<8x512xi1>
    %48 = vector.broadcast %cst_17 : f32 to vector<8x512xf32>
    %49 = arith.select %47, %24, %48 : vector<8x512xi1>, vector<8x512xf32>
    %cst_18 = arith.constant dense<0.000000e+00> : vector<512xf32>
    %50 = vector.multi_reduction <add>, %49, %cst_18 [0] : vector<8x512xf32> to vector<512xf32>
    %51 = vector.shape_cast %50 : vector<512xf32> to vector<1x512xf32>
    %52 = vector.shape_cast %51 : vector<1x512xf32> to vector<1x1x512xf32>
    %c0_19 = arith.constant 0 : index
    %c0_20 = arith.constant 0 : index
    %c0_21 = arith.constant 0 : index
    %53 = vector.load %arg7[%c0_19, %c0_20, %c0_21] : memref<1x1x512xf32, #tpu.memory_space<vmem>>, vector<1x1x512xf32>
    tpu.vector_store %arg7[%c0_19, %c0_20, %c0_21], %52 {strides = array<i32>} : memref<1x1x512xf32, #tpu.memory_space<vmem>>, vector<1x1x512xf32>,
    %54 = vector.shape_cast %45 : vector<1x1xf32> to vector<1x1x1xf32>
    %55 = vector.shape_cast %54 : vector<1x1x1xf32> to vector<1x1x1xf32>
    %56 = vector.broadcast %55 : vector<1x1x1xf32> to vector<1x1x128xf32>
    %c0_22 = arith.constant 0 : index
    %c0_23 = arith.constant 0 : index
    %c0_24 = arith.constant 0 : index
    %57 = vector.load %arg8[%c0_22, %c0_23, %c0_24] : memref<1x1x128xf32, #tpu.memory_space<vmem>>, vector<1x1x128xf32>
    tpu.vector_store %arg8[%c0_22, %c0_23, %c0_24], %56 {strides = array<i32>} : memref<1x1x128xf32, #tpu.memory_space<vmem>>, vector<1x1x128xf32>,
    return
  }
  func.func @transform_0(%arg0: i32) -> (i32, i32) {
    %c0_i32 = arith.constant 0 : i32
    %c0_i32_0 = arith.constant 0 : i32
    return %arg0, %c0_i32 : i32, i32
  }
  func.func @transform_1(%arg0: i32) -> (i32, i32) {
    %c0_i32 = arith.constant 0 : i32
    %c0_i32_0 = arith.constant 0 : i32
    %c0_i32_1 = arith.constant 0 : i32
    return %c0_i32, %c0_i32_0 : i32, i32
  }
  func.func @transform_2(%arg0: i32) -> (i32, i32) {
    %c0_i32 = arith.constant 0 : i32
    %c0_i32_0 = arith.constant 0 : i32
    %c0_i32_1 = arith.constant 0 : i32
    return %c0_i32, %c0_i32_0 : i32, i32
  }
  func.func @transform_3(%arg0: i32) -> (i32, i32) {
    %c0_i32 = arith.constant 0 : i32
    %c0_i32_0 = arith.constant 0 : i32
    %c0_i32_1 = arith.constant 0 : i32
    return %c0_i32, %c0_i32_0 : i32, i32
  }
  func.func @transform_4(%arg0: i32) -> (i32, i32) {
    %c0_i32 = arith.constant 0 : i32
    %c0_i32_0 = arith.constant 0 : i32
    return %arg0, %c0_i32 : i32, i32
  }
  func.func @transform_5(%arg0: i32) -> (i32, i32) {
    %c0_i32 = arith.constant 0 : i32
    %c0_i32_0 = arith.constant 0 : i32
    return %arg0, %c0_i32 : i32, i32
  }
  func.func @transform_6(%arg0: i32) -> (i32, i32, i32) {
    %c0_i32 = arith.constant 0 : i32
    %c0_i32_0 = arith.constant 0 : i32
    %c0_i32_1 = arith.constant 0 : i32
    return %arg0, %c0_i32, %c0_i32_0 : i32, i32, i32
  }
  func.func @transform_7(%arg0: i32) -> (i32, i32, i32) {
    %c0_i32 = arith.constant 0 : i32
    %c0_i32_0 = arith.constant 0 : i32
    %c0_i32_1 = arith.constant 0 : i32
    return %arg0, %c0_i32, %c0_i32_0 : i32, i32, i32
  }
}

</mosaic_0001>

<bundles_post_ra>
// kernel: tpu_custom_call.1
= control target key start
LH: loop header
LB: loop body
LE: loop exit
PB: predicated region body
PF: predicated region fallthrough
CT: control target
= control target key end

     0   :  { %13 = vsyncpa [#allocation3], 0  ;;  %s1848_s0 = inlined_call_operand.hbm [shape: f32[2,256], index: 0, kind: input, shape index: {}]   ;;  %s1849_s1 = inlined_call_operand.hbm [shape: bf16[256,512], index: 1, kind: input, shape index: {}]   ;;  %s1850_s2 = inlined_call_operand.hbm [shape: f32[512,256], index: 2, kind: input, shape index: {}]   ;;  %s1851_s3 = inlined_call_operand.vmem [shape: f32[1,512], index: 3, kind: input, shape index: {}]   ;;  %s1852_s4 = inlined_call_operand.hbm [shape: f32[2,512], index: 4, kind: output, shape index: {0}]   ;;  %s1853_s5 = inlined_call_operand.hbm [shape: f32[2,256], index: 5, kind: output, shape index: {1}]   ;;  %s1854_s6 = inlined_call_operand.hbm [shape: f32[1,1,512], index: 6, kind: output, shape index: {2}]   ;;  %s1855_s7 = inlined_call_operand.hbm [shape: f32[1,1,128], index: 7, kind: output, shape index: {3}]  }
   0x1   :  { %14 = vsyncpa [#allocation6], 0 }
   0x2   :  { %15 = vsyncpa [#allocation4], 0 }
   0x3   :  { %16 = vsyncpa [#allocation10], 0 }
   0x4   :  { %17 = vsyncpa [#allocation13], 0 }
   0x5   :  { %22 = vsyncadd [#allocation3], 192  ;;  %s1623_s24 = smov [#allocation5]   ;;  %s1459_s28 = scalar_lea.hbm %s1849_s1, 8192 }
   0x6   :  { %s35_s25 = sshll.u32 %s1623_s24, 4  ;;  %p1460_p0 = scmp.ne.s32.totalorder %s1849_s1, %s1459_s28  ;;  %s36_s25 = int_to_ptr.vmem [resolvable:$true] %s35_s25 }
   0x7   :  { %p1463_p1 = scmp.lt.u32.totalorder %s1459_s28, %s1849_s1 }
   0x9   :  { %p1465_p2 = pnand %p1463_p1, %p1460_p0 }
   0xb   :  { %1468 = shalt.err (!%p1465_p2)
}
   0xc   :  { %s1469_s10 = scalar_lea.vmem %s36_s25, 8192  ;;  %p1474_p4 = scmp.lt.s32.totalorder %s36_s25, %s36_s25 }
   0xd   :  { %p1470_p3 = scmp.ne.s32.totalorder %s36_s25, %s1469_s10  ;;  %p1475_p5 = scmp.lt.s32.totalorder %s1469_s10, %s1469_s10 }
   0xf   :  { %p1476_p6 = por %p1475_p5, %p1474_p4 }
  0x11   :  { %p1477_p7 = pnand %p1476_p6, %p1470_p3 }
  0x13   :  { %1480 = shalt.err (!%p1477_p7)
}
  0x14   :  { %s1624_s11 = smov 256   ;;  %s1625_s12 = smov 16  }
  0x15   :  { %41 = dma.hbm_to_vmem [thread:$0]  %s1849_s1, 8192, %s36_s25, [#allocation6], %s1624_s11, %s1624_s11, %s1625_s12  }
  0x16   :  { %s1626_s15 = smov [#allocation2]   ;;  %s1481_s19 = scalar_lea.hbm %s1848_s0, 64 }
  0x17   :  { %s23_s16 = sshll.u32 %s1626_s15, 4  ;;  %p1482_p8 = scmp.ne.s32.totalorder %s1848_s0, %s1481_s19  ;;  %s24_s16 = int_to_ptr.vmem [resolvable:$true] %s23_s16 }
  0x18   :  { %p1485_p9 = scmp.lt.u32.totalorder %s1481_s19, %s1848_s0 }
  0x1a   :  { %p1487_p10 = pnand %p1485_p9, %p1482_p8 }
  0x1c   :  { %1490 = shalt.err (!%p1487_p10)
}
  0x1d   :  { %s1491_s24 = scalar_lea.vmem %s24_s16, 64  ;;  %s1495_s1 = scalar_lea.vmem %s24_s16, 256 }
  0x1e   :  { %p1492_p11 = scmp.ne.s32.totalorder %s24_s16, %s1491_s24  ;;  %p1496_p12 = scmp.lt.s32.totalorder %s24_s16, %s24_s16 }
  0x1f   :  { %p1497_p13 = scmp.lt.s32.totalorder %s1495_s1, %s1491_s24 }
  0x21   :  { %p1498_p0 = por %p1497_p13, %p1496_p12 }
  0x23   :  { %p1499_p1 = pnand %p1498_p0, %p1492_p11 }
  0x25   :  { %1502 = shalt.err (!%p1499_p1)
}
  0x26   :  { %s1627_s25 = smov 64   ;;  %s1628_s26 = smov 4  }
  0x27   :  { %29 = dma.hbm_to_vmem [thread:$0]  %s1848_s0, 64, %s24_s16, [#allocation3], %s1627_s25, %s1627_s25, %s1628_s26  }
  0x28   :  { %s1629_s29 = smov [#allocation7]   ;;  %s1503_s10 = scalar_lea.hbm %s1850_s2, 16384 }
  0x29   :  { %s47_s30 = sshll.u32 %s1629_s29, 4  ;;  %p1504_p2 = scmp.ne.s32.totalorder %s1850_s2, %s1503_s10  ;;  %s48_s30 = int_to_ptr.vmem [resolvable:$true] %s47_s30 }
  0x2a   :  { %p1507_p3 = scmp.lt.u32.totalorder %s1503_s10, %s1850_s2 }
  0x2c   :  { %p1509_p4 = pnand %p1507_p3, %p1504_p2 }
  0x2e   :  { %1512 = shalt.err (!%p1509_p4)
}
  0x2f   :  { %s1513_s18 = scalar_lea.vmem %s48_s30, 16384  ;;  %p1518_p6 = scmp.lt.s32.totalorder %s48_s30, %s48_s30 }
  0x30   :  { %p1514_p5 = scmp.ne.s32.totalorder %s48_s30, %s1513_s18  ;;  %p1519_p7 = scmp.lt.s32.totalorder %s1513_s18, %s1513_s18 }
  0x32   :  { %p1520_p8 = por %p1519_p7, %p1518_p6 }
  0x34   :  { %p1521_p9 = pnand %p1520_p8, %p1514_p5 }
  0x36   :  { %1524 = shalt.err (!%p1521_p9)
}
  0x37   :  { %53 = dma.hbm_to_vmem [thread:$0]  %s1850_s2, 16384, %s48_s30, [#allocation6], %s1624_s11, %s1624_s11, %s1625_s12  }
  0x38   :  { %1613 = dma.done.wait [#allocation3], 256  }
  0x39   :  { %1614 = vsyncadd [#allocation3], 4294967040 }
  0x3a   :  { %1615 = dma.done.wait [#allocation6], 24576  }
  0x3b   :  { %1616 = vsyncadd [#allocation6], 4294942720  ;;  %v1359_v0 = vld [vmem:[#allocation5 + $0x4] ss:$16 sps:$4 sm:$0xff]   ;;  %v1361_v1 = vld [vmem:[#allocation5 + $0xc] ss:$16 sps:$4 sm:$0xff]   ;;  %v78_v40 = vlaneseq }
  0x3c   :  { %479 = vmatprep.subr.bf16.mxu0 %v1359_v0  ;;  %v1363_v2 = vld [vmem:[#allocation5] ss:$16 sps:$4 sm:$0xff]   ;;  %v1364_v3 = vld [vmem:[#allocation5 + $0x8] ss:$16 sps:$4 sm:$0xff]   ;;  %520 = vmatprep.subr.bf16.mxu1 %v1361_v1  ;;  %v1365_v4 = vld [vmem:[#allocation5 + $0x24] ss:$16 sps:$4 sm:$0xff]  }
  0x3d   :  { %480 = vmatpush1.bf16.msra.mxu0 %v1363_v2  ;;  %521 = vmatpush1.bf16.msra.mxu1 %v1364_v3  ;;  %v1367_v5 = vld [vmem:[#allocation5 + $0x2c] ss:$16 sps:$4 sm:$0xff]   ;;  %v1369_v6 = vld [vmem:[#allocation5 + $0x20] ss:$16 sps:$4 sm:$0xff]   ;;  %v1370_v7 = vld [vmem:[#allocation5 + $0x28] ss:$16 sps:$4 sm:$0xff]  }
  0x3e   :  { %481 = vmatprep.subr.bf16.mxu0 %v1365_v4  ;;  %522 = vmatprep.subr.bf16.mxu1 %v1367_v5  ;;  %v1371_v8 = vld [vmem:[#allocation5 + $0x44] ss:$16 sps:$4 sm:$0xff]   ;;  %v1373_v9 = vld [vmem:[#allocation5 + $0x4c] ss:$16 sps:$4 sm:$0xff]   ;;  %v1375_v10 = vld [vmem:[#allocation5 + $0x40] ss:$16 sps:$4 sm:$0xff]  }
  0x3f   :  { %v1376_v11 = vld [vmem:[#allocation5 + $0x48] ss:$16 sps:$4 sm:$0xff]   ;;  %v1377_v12 = vld [vmem:[#allocation5 + $0x64] ss:$16 sps:$4 sm:$0xff]   ;;  %v1379_v13 = vld [vmem:[#allocation5 + $0x6c] ss:$16 sps:$4 sm:$0xff]  }
  0x40   :  { %v1381_v14 = vld [vmem:[#allocation5 + $0x60] ss:$16 sps:$4 sm:$0xff]   ;;  %v1382_v15 = vld [vmem:[#allocation5 + $0x68] ss:$16 sps:$4 sm:$0xff]   ;;  %v1383_v16 = vld [vmem:[#allocation5 + $0x84] ss:$16 sps:$4 sm:$0xff]  }
  0x41   :  { %482 = vmatpush1.bf16.msra.mxu0 %v1369_v6  ;;  %523 = vmatpush1.bf16.msra.mxu1 %v1370_v7  ;;  %v1385_v17 = vld [vmem:[#allocation5 + $0x8c] ss:$16 sps:$4 sm:$0xff]   ;;  %v1387_v18 = vld [vmem:[#allocation5 + $0x80] ss:$16 sps:$4 sm:$0xff]   ;;  %v1388_v19 = vld [vmem:[#allocation5 + $0x88] ss:$16 sps:$4 sm:$0xff]  }
  0x42   :  { %483 = vmatprep.subr.bf16.mxu0 %v1371_v8  ;;  %524 = vmatprep.subr.bf16.mxu1 %v1373_v9  ;;  %v1389_v20 = vld [vmem:[#allocation5 + $0xa4] ss:$16 sps:$4 sm:$0xff]   ;;  %v1391_v21 = vld [vmem:[#allocation5 + $0xac] ss:$16 sps:$4 sm:$0xff]   ;;  %v1393_v22 = vld [vmem:[#allocation5 + $0xa0] ss:$16 sps:$4 sm:$0xff]  }
  0x43   :  { %v1394_v23 = vld [vmem:[#allocation5 + $0xa8] ss:$16 sps:$4 sm:$0xff]   ;;  %v1395_v24 = vld [vmem:[#allocation5 + $0xc4] ss:$16 sps:$4 sm:$0xff]   ;;  %v1397_v25 = vld [vmem:[#allocation5 + $0xcc] ss:$16 sps:$4 sm:$0xff]  }
  0x44   :  { %v1399_v26 = vld [vmem:[#allocation5 + $0xc0] ss:$16 sps:$4 sm:$0xff]   ;;  %v1400_v27 = vld [vmem:[#allocation5 + $0xc8] ss:$16 sps:$4 sm:$0xff]   ;;  %v1401_v28 = vld [vmem:[#allocation5 + $0xe4] ss:$16 sps:$4 sm:$0xff]  }
  0x45   :  { %484 = vmatpush1.bf16.msra.mxu0 %v1375_v10  ;;  %525 = vmatpush1.bf16.msra.mxu1 %v1376_v11  ;;  %v1403_v29 = vld [vmem:[#allocation5 + $0xec] ss:$16 sps:$4 sm:$0xff]   ;;  %v1405_v30 = vld [vmem:[#allocation5 + $0xe0] ss:$16 sps:$4 sm:$0xff]   ;;  %v1406_v31 = vld [vmem:[#allocation5 + $0xe8] ss:$16 sps:$4 sm:$0xff]  }
  0x46   :  { %485 = vmatprep.subr.bf16.mxu0 %v1377_v12  ;;  %526 = vmatprep.subr.bf16.mxu1 %v1379_v13  ;;  %v1407_v32 = vld [vmem:[#allocation5 + $0x104] ss:$16 sps:$4 sm:$0xff]   ;;  %v1409_v33 = vld [vmem:[#allocation5 + $0x10c] ss:$16 sps:$4 sm:$0xff]   ;;  %v1411_v34 = vld [vmem:[#allocation5 + $0x100] ss:$16 sps:$4 sm:$0xff]  }
  0x47   :  { %v1412_v35 = vld [vmem:[#allocation5 + $0x108] ss:$16 sps:$4 sm:$0xff]   ;;  %v1413_v36 = vld [vmem:[#allocation5 + $0x124] ss:$16 sps:$4 sm:$0xff]   ;;  %v1415_v37 = vld [vmem:[#allocation5 + $0x12c] ss:$16 sps:$4 sm:$0xff]  }
  0x48   :  { %v1630_v38 = vmov 1983009808   ;;  %v1417_v41 = vld [vmem:[#allocation5 + $0x120] ss:$16 sps:$4 sm:$0xff]   ;;  %v1418_v42 = vld [vmem:[#allocation5 + $0x128] ss:$16 sps:$4 sm:$0xff]  }
  0x49   :  { %486 = vmatpush1.bf16.msra.mxu0 %v1381_v14  ;;  %527 = vmatpush1.bf16.msra.mxu1 %v1382_v15  ;;  %v76_v39 = vunpack.c.l.s4 %v1630_v38  ;;  %v1419_v43 = vld [vmem:[#allocation5 + $0x144] ss:$16 sps:$4 sm:$0xff]   ;;  %v1421_v44 = vld [vmem:[#allocation5 + $0x14c] ss:$16 sps:$4 sm:$0xff]   ;;  %v1726_v46 = vshrl.u32 %v78_v40, 7  ;;  %vm1070_vm13 = vcmp.lt.s32.totalorder %v78_v40, 512 }
  0x4a   :  { %487 = vmatprep.subr.bf16.mxu0 %v1383_v16  ;;  %528 = vmatprep.subr.bf16.mxu1 %v1385_v17  ;;  %v1423_v47 = vld [vmem:[#allocation5 + $0x140] ss:$16 sps:$4 sm:$0xff]   ;;  %v1424_v48 = vld [vmem:[#allocation5 + $0x148] ss:$16 sps:$4 sm:$0xff]   ;;  %v1425_v49 = vld [vmem:[#allocation5 + $0x164] ss:$16 sps:$4 sm:$0xff]  }
  0x4b   :  { %v77_v45 = vunpack.c.0.s8 %v76_v39  ;;  %v1427_v50 = vld [vmem:[#allocation5 + $0x16c] ss:$16 sps:$4 sm:$0xff]   ;;  %v1429_v51 = vld [vmem:[#allocation5 + $0x160] ss:$16 sps:$4 sm:$0xff]   ;;  %v1430_v53 = vld [vmem:[#allocation5 + $0x168] ss:$16 sps:$4 sm:$0xff]  }
  0x4c   :  { %v1457_v54 = vld.sshfl [vmem:[#allocation2] sm:$0xff pattern:$0x76325410]  ;;  %v1458_v55 = vld.sshfl [vmem:[#allocation2 + $0x8] sm:$0xff pattern:$0x76325410] }
  0x4d   :  { %488 = vmatpush1.bf16.msra.mxu0 %v1387_v18  ;;  %529 = vmatpush1.bf16.msra.mxu1 %v1388_v19  ;;  %v1729_v52 = vsub.s32 %v77_v45, %v1726_v46  ;;  %v1431_v56 = vld [vmem:[#allocation5 + $0x184] ss:$16 sps:$4 sm:$0xff]   ;;  %v1433_v57 = vld [vmem:[#allocation5 + $0x18c] ss:$16 sps:$4 sm:$0xff]   ;;  %v1435_v58 = vld [vmem:[#allocation5 + $0x180] ss:$16 sps:$4 sm:$0xff]   ;;  %v1731_v60 = vcombine.high %v1457_v54, %v1458_v55  ;;  %v1735_v8 = vcombine.low %v1457_v54, %v1458_v55 }
  0x4e   :  { %489 = vmatprep.subr.bf16.mxu0 %v1389_v20  ;;  %530 = vmatprep.subr.bf16.mxu1 %v1391_v21  ;;  %v1436_v59 = vld [vmem:[#allocation5 + $0x188] ss:$16 sps:$4 sm:$0xff]   ;;  %v1437_v61 = vld [vmem:[#allocation5 + $0x1a4] ss:$16 sps:$4 sm:$0xff]   ;;  %v1439_v62 = vld [vmem:[#allocation5 + $0x1ac] ss:$16 sps:$4 sm:$0xff]  }
  0x4f   :  { %v94_v63 = vpack.c.bf16 %v1731_v60, %v1731_v60  ;;  %v1441_v0 = vld [vmem:[#allocation5 + $0x1a0] ss:$16 sps:$4 sm:$0xff]   ;;  %v1442_v1 = vld [vmem:[#allocation5 + $0x1a8] ss:$16 sps:$4 sm:$0xff]   ;;  %v1443_v2 = vld [vmem:[#allocation5 + $0x1c4] ss:$16 sps:$4 sm:$0xff]   ;;  %v93_v11 = vpack.c.bf16 %v1735_v8, %v1735_v8 }
  0x50   :  { %v1445_v3 = vld [vmem:[#allocation5 + $0x1cc] ss:$16 sps:$4 sm:$0xff]   ;;  %v1447_v4 = vld [vmem:[#allocation5 + $0x1c0] ss:$16 sps:$4 sm:$0xff]   ;;  %v1448_v5 = vld [vmem:[#allocation5 + $0x1c8] ss:$16 sps:$4 sm:$0xff]  }
  0x51   :  { %490 = vmatpush1.bf16.msra.mxu0 %v1393_v22  ;;  %531 = vmatpush1.bf16.msra.mxu1 %v1394_v23  ;;  %v1449_v6 = vld [vmem:[#allocation5 + $0x1e4] ss:$16 sps:$4 sm:$0xff]   ;;  %v1451_v7 = vld [vmem:[#allocation5 + $0x1ec] ss:$16 sps:$4 sm:$0xff]   ;;  %v1453_v9 = vld [vmem:[#allocation5 + $0x1e0] ss:$16 sps:$4 sm:$0xff]  }
  0x52   :  { %491 = vmatprep.subr.bf16.mxu0 %v1395_v24  ;;  %532 = vmatprep.subr.bf16.mxu1 %v1397_v25  ;;  %v1454_v10 = vld [vmem:[#allocation5 + $0x1e8] ss:$16 sps:$4 sm:$0xff]   ;;  %v569_v12 = vsub.s32 0, %v1726_v46  ;;  %v577_v13 = vsub.s32 2, %v1726_v46  ;;  %v561_v14 = vld [vmem:[%s1851_s3] sm:$0xf] }
  0x53   :  { %511 = vmatprep.mubr.bf16.mxu0 %v94_v63  ;;  %552 = vmatprep.mubr.bf16.mxu1 %v94_v63  ;;  %v573_v15 = vsub.s32 1, %v1726_v46  ;;  %v581_v16 = vsub.s32 3, %v1726_v46  ;;  %v641_v63 = vld [vmem:[#allocation7] sm:$0xff]  ;;  %vm992_vm8 = vcmp.lt.s32.totalorder %v1726_v46, 2 }
  0x54   :  { %v570_v17 = vrot.slane %v561_v14, %v569_v12  ;;  %v578_v18 = vrot.slane %v561_v14, %v577_v13  ;;  %v645_v13 = vld [vmem:[#allocation7 + $0x20] sm:$0xff] }
  0x55   :  { %492 = vmatpush1.bf16.msra.mxu0 %v1399_v26  ;;  %533 = vmatpush1.bf16.msra.mxu1 %v1400_v27  ;;  %v574_v21 = vrot.slane %v561_v14, %v573_v15  ;;  %v582_v22 = vrot.slane %v561_v14, %v581_v16  ;;  %v647_v14 = vld [vmem:[#allocation7 + $0x30] sm:$0xff]  ;;  %v709_v15 = vld [vmem:[#allocation7 + $0x220] sm:$0xff] }
  0x56   :  { %493 = vmatprep.subr.bf16.mxu0 %v1401_v28  ;;  %534 = vmatprep.subr.bf16.mxu1 %v1403_v29  ;;  %v1216_v16 = vpack.c.bf16 %v647_v14, %v645_v13  ;;  %v668_v13 = vld [vmem:[#allocation7 + $0xd8] sm:$0xff]  ;;  %v730_v14 = vld [vmem:[#allocation7 + $0x2c8] sm:$0xff] }
  0x59   :  { %494 = vmatpush1.bf16.msra.mxu0 %v1405_v30  ;;  %535 = vmatpush1.bf16.msra.mxu1 %v1406_v31 }
  0x5a   :  { %495 = vmatprep.subr.bf16.mxu0 %v1407_v32  ;;  %536 = vmatprep.subr.bf16.mxu1 %v1409_v33 }
  0x5d   :  { %496 = vmatpush1.bf16.msra.mxu0 %v1411_v34  ;;  %537 = vmatpush1.bf16.msra.mxu1 %v1412_v35 }
  0x5e   :  { %497 = vmatprep.subr.bf16.mxu0 %v1413_v36  ;;  %538 = vmatprep.subr.bf16.mxu1 %v1415_v37 }
  0x61   :  { %498 = vmatpush1.bf16.msra.mxu0 %v1417_v41  ;;  %539 = vmatpush1.bf16.msra.mxu1 %v1418_v42  ;;  %v1747_v41 = vand.u32 127, %v78_v40 }
  0x62   :  { %499 = vmatprep.subr.bf16.mxu0 %v1419_v43  ;;  %540 = vmatprep.subr.bf16.mxu1 %v1421_v44 }
  0x63   :  { %v1750_v42 = vadd.s32 128, %v1747_v41  ;;  %v1753_v43 = vadd.s32 256, %v1747_v41  ;;  %v1756_v44 = vadd.s32 384, %v1747_v41 }
  0x65   :  { %500 = vmatpush1.bf16.msra.mxu0 %v1423_v47  ;;  %541 = vmatpush1.bf16.msra.mxu1 %v1424_v48 }
  0x66   :  { %501 = vmatprep.subr.bf16.mxu0 %v1425_v49  ;;  %542 = vmatprep.subr.bf16.mxu1 %v1427_v50 }
  0x69   :  { %502 = vmatpush1.bf16.msra.mxu0 %v1429_v51  ;;  %543 = vmatpush1.bf16.msra.mxu1 %v1430_v53 }
  0x6a   :  { %503 = vmatprep.subr.bf16.mxu0 %v1431_v56  ;;  %544 = vmatprep.subr.bf16.mxu1 %v1433_v57  ;;  %v642_v57 = vld [vmem:[#allocation7 + $0x8] sm:$0xff] }
  0x6d   :  { %504 = vmatpush1.bf16.msra.mxu0 %v1435_v58  ;;  %545 = vmatpush1.bf16.msra.mxu1 %v1436_v59  ;;  %v644_v58 = vld [vmem:[#allocation7 + $0x18] sm:$0xff]  ;;  %v706_v59 = vld [vmem:[#allocation7 + $0x208] sm:$0xff] }
  0x6e   :  { %505 = vmatprep.subr.bf16.mxu0 %v1437_v61  ;;  %546 = vmatprep.subr.bf16.mxu1 %v1439_v62  ;;  %v1210_v61 = vpack.c.bf16 %v644_v58, %v642_v57  ;;  %v708_v62 = vld [vmem:[#allocation7 + $0x218] sm:$0xff]  ;;  %v657_v57 = vld [vmem:[#allocation7 + $0x80] sm:$0xff]  ;;  %v659_v58 = vld [vmem:[#allocation7 + $0x90] sm:$0xff] }
  0x71   :  { %506 = vmatpush1.bf16.msra.mxu0 %v1441_v0  ;;  %547 = vmatpush1.bf16.msra.mxu1 %v1442_v1  ;;  %v643_v0 = vld [vmem:[#allocation7 + $0x10] sm:$0xff]  ;;  %v1274_v1 = vpack.c.bf16 %v708_v62, %v706_v59  ;;  %v721_v59 = vld [vmem:[#allocation7 + $0x280] sm:$0xff] }
  0x72   :  { %507 = vmatprep.subr.bf16.mxu0 %v1443_v2  ;;  %548 = vmatprep.subr.bf16.mxu1 %v1445_v3  ;;  %v1212_v2 = vpack.c.bf16 %v643_v0, %v641_v63  ;;  %v705_v3 = vld [vmem:[#allocation7 + $0x200] sm:$0xff]  ;;  %v723_v62 = vld [vmem:[#allocation7 + $0x290] sm:$0xff]  ;;  %v662_v63 = vld [vmem:[#allocation7 + $0xa8] sm:$0xff] }
  0x73   :  { %v664_v0 = vld [vmem:[#allocation7 + $0xb8] sm:$0xff] }
  0x75   :  { %508 = vmatpush1.bf16.msra.mxu0 %v1447_v4  ;;  %549 = vmatpush1.bf16.msra.mxu1 %v1448_v5  ;;  %v707_v4 = vld [vmem:[#allocation7 + $0x210] sm:$0xff]  ;;  %v646_v5 = vld [vmem:[#allocation7 + $0x28] sm:$0xff] }
  0x76   :  { %509 = vmatprep.subr.bf16.mxu0 %v1449_v6  ;;  %550 = vmatprep.subr.bf16.mxu1 %v1451_v7  ;;  %v1276_v6 = vpack.c.bf16 %v707_v4, %v705_v3  ;;  %v648_v7 = vld [vmem:[#allocation7 + $0x38] sm:$0xff]  ;;  %v1228_v3 = vpack.c.bf16 %v659_v58, %v657_v57  ;;  %v1292_v4 = vpack.c.bf16 %v723_v62, %v721_v59  ;;  %v678_v57 = vld [vmem:[#allocation7 + $0x128] sm:$0xff] }
  0x77   :  { %v680_v58 = vld [vmem:[#allocation7 + $0x138] sm:$0xff]  ;;  %v742_v59 = vld [vmem:[#allocation7 + $0x328] sm:$0xff] }
  0x79   :  { %510 = vmatpush1.bf16.msra.mxu0 %v1453_v9  ;;  %551 = vmatpush1.bf16.msra.mxu1 %v1454_v10  ;;  %v710_v9 = vld [vmem:[#allocation7 + $0x228] sm:$0xff]  ;;  %v712_v10 = vld [vmem:[#allocation7 + $0x238] sm:$0xff] }
  0x7a   :  { %1211 = vmatprep.subr.bf16.mxu1 %v1210_v61  ;;  %1275 = vmatprep.subr.bf16.mxu0 %v1274_v1  ;;  %v1278_v12 = vpack.c.bf16 %v712_v10, %v710_v9  ;;  %v726_v1 = vld [vmem:[#allocation7 + $0x2a8] sm:$0xff]  ;;  %v725_v9 = vld [vmem:[#allocation7 + $0x2a0] sm:$0xff] }
  0x7c   :  { %512 = vmatmul.mubr.bf16.vlgmr.msra.gmra.mrb[0].mxu0 %v93_v11  ;;  %553 = vmatmul.mubr.bf16.vlgmr.msra.gmra.mrb[0].mxu1 %v93_v11  ;;  %v1214_v11 = vpack.c.bf16 %v648_v7, %v646_v5  ;;  %v1230_v5 = vpack.c.bf16 %v664_v0, %v662_v63  ;;  %v663_v7 = vld [vmem:[#allocation7 + $0xb0] sm:$0xff]  ;;  %v1246_v0 = vpack.c.bf16 %v680_v58, %v678_v57 }
  0x7d   :  { %1213 = vmatpush1.bf16.msra.mxu1 %v1212_v2  ;;  %1277 = vmatpush1.bf16.msra.mxu0 %v1276_v6  ;;  %v728_v2 = vld [vmem:[#allocation7 + $0x2b8] sm:$0xff]  ;;  %v661_v6 = vld [vmem:[#allocation7 + $0xa0] sm:$0xff] }
  0x7e   :  { %1215 = vmatprep.subr.bf16.mxu1 %v1214_v11  ;;  %1279 = vmatprep.subr.bf16.mxu0 %v1278_v12  ;;  %v1294_v10 = vpack.c.bf16 %v728_v2, %v726_v1  ;;  %v727_v11 = vld [vmem:[#allocation7 + $0x2b0] sm:$0xff]  ;;  %v666_v12 = vld [vmem:[#allocation7 + $0xc8] sm:$0xff]  ;;  %v677_v1 = vld [vmem:[#allocation7 + $0x120] sm:$0xff] }
  0x7f   :  { %v679_v2 = vld [vmem:[#allocation7 + $0x130] sm:$0xff] }
  0x81   :  { %1217 = vmatpush1.bf16.msra.mxu1 %v1216_v16  ;;  %v1232_v16 = vpack.c.bf16 %v663_v7, %v661_v6  ;;  %v682_v6 = vld [vmem:[#allocation7 + $0x148] sm:$0xff]  ;;  %v684_v7 = vld [vmem:[#allocation7 + $0x158] sm:$0xff] }
 0x14f   :  { %v513_v19 = vpop.f32.mrb[0].mxu0  ;;  %v554_v20 = vpop.f32.mrb[0].mxu1 }
 0x150   :  { %v562_v23 = vmul.f32 2.0, %v513_v19  ;;  %v564_v24 = vmul.f32 2.0, %v554_v20  ;;  %v515_v25 = vpop.f32.mrb[1].mxu0  ;;  %v556_v26 = vpop.f32.mrb[1].mxu1  ;;  %v652_v19 = vld [vmem:[#allocation7 + $0x58] sm:$0xff] }
 0x151   :  { %v563_v27 = vmul.f32 2.0, %v515_v25  ;;  %v565_v28 = vmul.f32 2.0, %v556_v26  ;;  %v517_v29 = vpop.f32.mrb[2].mxu0  ;;  %v558_v30 = vpop.f32.mrb[2].mxu1  ;;  %v651_v26 = vld [vmem:[#allocation7 + $0x50] sm:$0xff] }
 0x152   :  { %v587_v31 = vsub.f32 %v570_v17, %v562_v23  ;;  %v589_v32 = vsub.f32 %v578_v18, %v564_v24  ;;  %v518_v33 = vpop.f32.mrb[3].mxu0  ;;  %v559_v34 = vpop.f32.mrb[3].mxu1  ;;  %v711_v17 = vld [vmem:[#allocation7 + $0x230] sm:$0xff]  ;;  %v650_v18 = vld [vmem:[#allocation7 + $0x48] sm:$0xff]  ;;  %v716_v23 = vld [vmem:[#allocation7 + $0x258] sm:$0xff] }
 0x153   :  { %v588_v35 = vsub.f32 %v574_v21, %v563_v27  ;;  %v590_v36 = vsub.f32 %v582_v22, %v565_v28  ;;  %v1280_v20 = vpack.c.bf16 %v711_v17, %v709_v15  ;;  %v1218_v21 = vpack.c.bf16 %v652_v19, %v650_v18  ;;  %v714_v22 = vld [vmem:[#allocation7 + $0x248] sm:$0xff]  ;;  %v649_v24 = vld [vmem:[#allocation7 + $0x40] sm:$0xff]  ;;  %v715_v28 = vld [vmem:[#allocation7 + $0x250] sm:$0xff] }
 0x154   :  { %v1282_v25 = vpack.c.bf16 %v716_v23, %v714_v22  ;;  %v713_v27 = vld [vmem:[#allocation7 + $0x240] sm:$0xff]  ;;  %v1220_v29 = vpack.c.bf16 %v651_v26, %v649_v24  ;;  %v654_v30 = vld [vmem:[#allocation7 + $0x68] sm:$0xff]  ;;  %v732_v15 = vld [vmem:[#allocation7 + $0x2d8] sm:$0xff]  ;;  %v1296_v17 = vpack.c.bf16 %v727_v11, %v725_v9  ;;  %v1234_v18 = vpack.c.bf16 %v668_v13, %v666_v12 }
 0x155   :  { %v596_v37 = vmin.f32 %v587_v31, %v588_v35  ;;  %v597_v38 = vmin.f32 %v589_v32, %v590_v36  ;;  %1281 = vmatpush1.bf16.msra.mxu0 %v1280_v20  ;;  %1219 = vmatprep.subr.bf16.mxu1 %v1218_v21  ;;  %v1284_v33 = vpack.c.bf16 %v715_v28, %v713_v27  ;;  %v665_v19 = vld [vmem:[#allocation7 + $0xc0] sm:$0xff]  ;;  %v667_v20 = vld [vmem:[#allocation7 + $0xd0] sm:$0xff]  ;;  %v670_v24 = vld [vmem:[#allocation7 + $0xe8] sm:$0xff] }
 0x156   :  { %1283 = vmatprep.subr.bf16.mxu0 %v1282_v25  ;;  %1221 = vmatpush1.bf16.msra.mxu1 %v1220_v29  ;;  %v729_v21 = vld [vmem:[#allocation7 + $0x2c0] sm:$0xff]  ;;  %v1298_v22 = vpack.c.bf16 %v732_v15, %v730_v14  ;;  %v731_v23 = vld [vmem:[#allocation7 + $0x2d0] sm:$0xff]  ;;  %v672_v25 = vld [vmem:[#allocation7 + $0xf8] sm:$0xff]  ;;  %v1236_v28 = vpack.c.bf16 %v667_v20, %v665_v19  ;;  %v1248_v11 = vpack.c.bf16 %v679_v2, %v677_v1 }
 0x157   :  { %v598_v39 = vmin.f32 %v596_v37, %v597_v38  ;;  %v655_v37 = vld [vmem:[#allocation7 + $0x70] sm:$0xff]  ;;  %v734_v26 = vld [vmem:[#allocation7 + $0x2e8] sm:$0xff]  ;;  %v736_v27 = vld [vmem:[#allocation7 + $0x2f8] sm:$0xff]  ;;  %v1300_v29 = vpack.c.bf16 %v731_v23, %v729_v21  ;;  %v1250_v13 = vpack.c.bf16 %v684_v7, %v682_v6 }
 0x158   :  { %v746_v9 = vld [vmem:[#allocation7 + $0x348] sm:$0xff]  ;;  %v681_v14 = vld [vmem:[#allocation7 + $0x140] sm:$0xff]  ;;  %v683_v15 = vld [vmem:[#allocation7 + $0x150] sm:$0xff] }
 0x159   :  { %599 = vmin.xlane.f32.xlu0 %v598_v39  ;;  %v717_v39 = vld [vmem:[#allocation7 + $0x260] sm:$0xff]  ;;  %1285 = vmatpush1.bf16.msra.mxu0 %v1284_v33  ;;  %v686_v19 = vld [vmem:[#allocation7 + $0x168] sm:$0xff]  ;;  %v688_v20 = vld [vmem:[#allocation7 + $0x178] sm:$0xff]  ;;  %v1252_v23 = vpack.c.bf16 %v683_v15, %v681_v14 }
 0x15a   :  { %v733_v33 = vld [vmem:[#allocation7 + $0x2e0] sm:$0xff]  ;;  %v750_v21 = vld [vmem:[#allocation7 + $0x368] sm:$0xff]  ;;  %v700_v2 = vld [vmem:[#allocation7 + $0x1d8] sm:$0xff] }
 0x15b   :  { %v698_v1 = vld [vmem:[#allocation7 + $0x1c8] sm:$0xff] }
 0x15c   :  { %v1266_v7 = vpack.c.bf16 %v700_v2, %v698_v1 }
 0x1e6   :  { %v600_v45 = vpop.xlane.xlu0 %599 }
 0x1e7   :  { %vm601_vm0 = vcmp.eq.f32.partialorder %v587_v31, %v600_v45  ;;  %vm602_vm1 = vcmp.eq.f32.partialorder %v588_v35, %v600_v45  ;;  %vm603_vm2 = vcmp.eq.f32.partialorder %v589_v32, %v600_v45  ;;  %vm604_vm3 = vcmp.eq.f32.partialorder %v590_v36, %v600_v45  ;;  %v656_v31 = vld [vmem:[#allocation7 + $0x78] sm:$0xff]  ;;  %v718_v32 = vld [vmem:[#allocation7 + $0x268] sm:$0xff]  ;;  %v653_v36 = vld [vmem:[#allocation7 + $0x60] sm:$0xff] }
 0x1e8   :  { %v605_v47 = vsel %vm601_vm0, %v1747_v41, 512  ;;  %v606_v48 = vsel %vm602_vm1, %v1750_v42, 512  ;;  %v607_v49 = vsel %vm603_vm2, %v1753_v43, 512  ;;  %v608_v50 = vsel %vm604_vm3, %v1756_v44, 512  ;;  %v720_v35 = vld [vmem:[#allocation7 + $0x278] sm:$0xff]  ;;  %v719_v45 = vld [vmem:[#allocation7 + $0x270] sm:$0xff] }
 0x1e9   :  { %vm609_vm4 = vcmp.lt.s32.totalorder %v605_v47, %v606_v48  ;;  %vm611_vm5 = vcmp.lt.s32.totalorder %v607_v49, %v608_v50  ;;  %v1222_v34 = vpack.c.bf16 %v656_v31, %v654_v30  ;;  %v1286_v38 = vpack.c.bf16 %v720_v35, %v718_v32  ;;  %v669_v31 = vld [vmem:[#allocation7 + $0xe0] sm:$0xff]  ;;  %v671_v32 = vld [vmem:[#allocation7 + $0xf0] sm:$0xff] }
 0x1ea   :  { %v610_v51 = vsel %vm609_vm4, %v605_v47, %v606_v48  ;;  %v612_v53 = vsel %vm611_vm5, %v607_v49, %v608_v50  ;;  %v658_v47 = vld [vmem:[#allocation7 + $0x88] sm:$0xff]  ;;  %v660_v48 = vld [vmem:[#allocation7 + $0x98] sm:$0xff]  ;;  %v1238_v30 = vpack.c.bf16 %v672_v25, %v670_v24  ;;  %v735_v35 = vld [vmem:[#allocation7 + $0x2f0] sm:$0xff]  ;;  %v1254_v25 = vpack.c.bf16 %v688_v20, %v686_v19 }
 0x1eb   :  { %vm613_vm6 = vcmp.lt.s32.totalorder %v610_v51, %v612_v53  ;;  %v722_v49 = vld [vmem:[#allocation7 + $0x288] sm:$0xff]  ;;  %v724_v50 = vld [vmem:[#allocation7 + $0x298] sm:$0xff]  ;;  %1223 = vmatprep.subr.bf16.mxu1 %v1222_v34  ;;  %1287 = vmatprep.subr.bf16.mxu0 %v1286_v38  ;;  %v1302_v34 = vpack.c.bf16 %v736_v27, %v734_v26  ;;  %v685_v26 = vld [vmem:[#allocation7 + $0x160] sm:$0xff] }
 0x1ec   :  { %v1762_v54 = vsel %vm613_vm6, %v610_v51, %v612_v53  ;;  %v1224_v51 = vpack.c.bf16 %v655_v37, %v653_v36  ;;  %v1288_v53 = vpack.c.bf16 %v719_v45, %v717_v39  ;;  %v1290_v61 = vpack.c.bf16 %v724_v50, %v722_v49  ;;  %v674_v36 = vld [vmem:[#allocation7 + $0x108] sm:$0xff]  ;;  %v676_v37 = vld [vmem:[#allocation7 + $0x118] sm:$0xff]  ;;  %v673_v49 = vld [vmem:[#allocation7 + $0x100] sm:$0xff] }
 0x1ed   :  { %v616_v55 = vshra.s32 %v1762_v54, 16  ;;  %v738_v38 = vld [vmem:[#allocation7 + $0x308] sm:$0xff]  ;;  %v740_v39 = vld [vmem:[#allocation7 + $0x318] sm:$0xff]  ;;  %v1240_v45 = vpack.c.bf16 %v671_v32, %v669_v31  ;;  %v675_v50 = vld [vmem:[#allocation7 + $0x110] sm:$0xff] }
 0x1ee   :  { %1225 = vmatpush1.bf16.msra.mxu1 %v1224_v51  ;;  %1289 = vmatpush1.bf16.msra.mxu0 %v1288_v53  ;;  %v737_v51 = vld [vmem:[#allocation7 + $0x300] sm:$0xff]  ;;  %v1306_v53 = vpack.c.bf16 %v740_v39, %v738_v38  ;;  %v1244_v62 = vpack.c.bf16 %v675_v50, %v673_v49  ;;  %v687_v27 = vld [vmem:[#allocation7 + $0x170] sm:$0xff]  ;;  %v690_v31 = vld [vmem:[#allocation7 + $0x188] sm:$0xff] }
 0x1ef   :  { %v1765_v56 = vcvt.s32.f32 %v616_v55  ;;  %v1226_v55 = vpack.c.bf16 %v660_v48, %v658_v47  ;;  %1291 = vmatprep.subr.bf16.mxu0 %v1290_v61  ;;  %v1304_v47 = vpack.c.bf16 %v735_v35, %v733_v33  ;;  %v1242_v48 = vpack.c.bf16 %v676_v37, %v674_v36  ;;  %v744_v61 = vld [vmem:[#allocation7 + $0x338] sm:$0xff]  ;;  %v754_v33 = vld [vmem:[#allocation7 + $0x388] sm:$0xff]  ;;  %v689_v38 = vld [vmem:[#allocation7 + $0x180] sm:$0xff] }
 0x1f0   :  { %v692_v32 = vld [vmem:[#allocation7 + $0x198] sm:$0xff]  ;;  %v1256_v35 = vpack.c.bf16 %v687_v27, %v685_v26  ;;  %v691_v39 = vld [vmem:[#allocation7 + $0x190] sm:$0xff]  ;;  %v694_v49 = vld [vmem:[#allocation7 + $0x1a8] sm:$0xff] }
 0x1f1   :  { %619 = vmin.xlane.f32.xlu0 %v1765_v56  ;;  %1227 = vmatprep.subr.bf16.mxu1 %v1226_v55  ;;  %v739_v55 = vld [vmem:[#allocation7 + $0x310] sm:$0xff]  ;;  %v1258_v37 = vpack.c.bf16 %v692_v32, %v690_v31  ;;  %v696_v50 = vld [vmem:[#allocation7 + $0x1b8] sm:$0xff]  ;;  %v702_v20 = vld [vmem:[#allocation7 + $0x1e8] sm:$0xff] }
 0x1f2   :  { %1229 = vmatpush1.bf16.msra.mxu1 %v1228_v3  ;;  %1293 = vmatpush1.bf16.msra.mxu0 %v1292_v4  ;;  %v1308_v63 = vpack.c.bf16 %v739_v55, %v737_v51  ;;  %v741_v3 = vld [vmem:[#allocation7 + $0x320] sm:$0xff]  ;;  %v1310_v4 = vpack.c.bf16 %v744_v61, %v742_v59  ;;  %v758_v51 = vld [vmem:[#allocation7 + $0x3a8] sm:$0xff]  ;;  %v1260_v55 = vpack.c.bf16 %v691_v39, %v689_v38  ;;  %v695_v61 = vld [vmem:[#allocation7 + $0x1b0] sm:$0xff] }
 0x1f3   :  { %1231 = vmatprep.subr.bf16.mxu1 %v1230_v5  ;;  %1295 = vmatprep.subr.bf16.mxu0 %v1294_v10  ;;  %v743_v5 = vld [vmem:[#allocation7 + $0x330] sm:$0xff]  ;;  %v748_v10 = vld [vmem:[#allocation7 + $0x358] sm:$0xff]  ;;  %v1262_v58 = vpack.c.bf16 %v696_v50, %v694_v49  ;;  %v693_v59 = vld [vmem:[#allocation7 + $0x1a0] sm:$0xff] }
 0x1f4   :  { %v1312_v12 = vpack.c.bf16 %v743_v5, %v741_v3  ;;  %v762_v3 = vld [vmem:[#allocation7 + $0x3c8] sm:$0xff]  ;;  %v1264_v5 = vpack.c.bf16 %v695_v61, %v693_v59  ;;  %v703_v26 = vld [vmem:[#allocation7 + $0x1f0] sm:$0xff] }
 0x1f6   :  { %1233 = vmatpush1.bf16.msra.mxu1 %v1232_v16  ;;  %1297 = vmatpush1.bf16.msra.mxu0 %v1296_v17  ;;  %v745_v16 = vld [vmem:[#allocation7 + $0x340] sm:$0xff]  ;;  %v1314_v17 = vpack.c.bf16 %v748_v10, %v746_v9  ;;  %v699_v10 = vld [vmem:[#allocation7 + $0x1d0] sm:$0xff] }
 0x1f7   :  { %1235 = vmatprep.subr.bf16.mxu1 %v1234_v18  ;;  %1299 = vmatprep.subr.bf16.mxu0 %v1298_v22  ;;  %v747_v18 = vld [vmem:[#allocation7 + $0x350] sm:$0xff]  ;;  %v752_v22 = vld [vmem:[#allocation7 + $0x378] sm:$0xff]  ;;  %v697_v9 = vld [vmem:[#allocation7 + $0x1c0] sm:$0xff] }
 0x1f8   :  { %v1316_v24 = vpack.c.bf16 %v747_v18, %v745_v16  ;;  %v1268_v14 = vpack.c.bf16 %v699_v10, %v697_v9  ;;  %v615_v16 = vand.u32 65535, %v1762_v54 }
 0x1fa   :  { %1237 = vmatpush1.bf16.msra.mxu1 %v1236_v28  ;;  %1301 = vmatpush1.bf16.msra.mxu0 %v1300_v29  ;;  %v749_v28 = vld [vmem:[#allocation7 + $0x360] sm:$0xff]  ;;  %v1318_v29 = vpack.c.bf16 %v752_v22, %v750_v21  ;;  %v617_v18 = vcvt.s32.f32 %v615_v16  ;;  %v704_v21 = vld [vmem:[#allocation7 + $0x1f8] sm:$0xff]  ;;  %v766_v22 = vld [vmem:[#allocation7 + $0x3e8] sm:$0xff] }
 0x1fb   :  { %1239 = vmatprep.subr.bf16.mxu1 %v1238_v30  ;;  %1303 = vmatprep.subr.bf16.mxu0 %v1302_v34  ;;  %v751_v30 = vld [vmem:[#allocation7 + $0x370] sm:$0xff]  ;;  %v756_v34 = vld [vmem:[#allocation7 + $0x398] sm:$0xff] }
 0x1fc   :  { %v1320_v36 = vpack.c.bf16 %v751_v30, %v749_v28  ;;  %v767_v30 = vld [vmem:[#allocation7 + $0x3f0] sm:$0xff] }
 0x1fe   :  { %1241 = vmatpush1.bf16.msra.mxu1 %v1240_v45  ;;  %1305 = vmatpush1.bf16.msra.mxu0 %v1304_v47  ;;  %v753_v45 = vld [vmem:[#allocation7 + $0x380] sm:$0xff]  ;;  %v1322_v47 = vpack.c.bf16 %v756_v34, %v754_v33 }
 0x1ff   :  { %1243 = vmatprep.subr.bf16.mxu1 %v1242_v48  ;;  %1307 = vmatprep.subr.bf16.mxu0 %v1306_v53  ;;  %v755_v48 = vld [vmem:[#allocation7 + $0x390] sm:$0xff]  ;;  %v760_v53 = vld [vmem:[#allocation7 + $0x3b8] sm:$0xff] }
 0x200   :  { %v1324_v57 = vpack.c.bf16 %v755_v48, %v753_v45 }
 0x202   :  { %1245 = vmatpush1.bf16.msra.mxu1 %v1244_v62  ;;  %1309 = vmatpush1.bf16.msra.mxu0 %v1308_v63  ;;  %v757_v62 = vld [vmem:[#allocation7 + $0x3a0] sm:$0xff]  ;;  %v1326_v63 = vpack.c.bf16 %v760_v53, %v758_v51 }
 0x203   :  { %1247 = vmatprep.subr.bf16.mxu1 %v1246_v0  ;;  %1311 = vmatprep.subr.bf16.mxu0 %v1310_v4  ;;  %v759_v0 = vld [vmem:[#allocation7 + $0x3b0] sm:$0xff]  ;;  %v764_v4 = vld [vmem:[#allocation7 + $0x3d8] sm:$0xff] }
 0x204   :  { %v1328_v6 = vpack.c.bf16 %v759_v0, %v757_v62  ;;  %v1633_v0 = vmov 1966171168  }
 0x205   :  { %v1046_v1 = vunpack.c.l.s4 %v1633_v0 }
 0x206   :  { %1249 = vmatpush1.bf16.msra.mxu1 %v1248_v11  ;;  %1313 = vmatpush1.bf16.msra.mxu0 %v1312_v12  ;;  %v1330_v11 = vpack.c.bf16 %v764_v4, %v762_v3  ;;  %v761_v12 = vld [vmem:[#allocation7 + $0x3c0] sm:$0xff] }
 0x207   :  { %1251 = vmatprep.subr.bf16.mxu1 %v1250_v13  ;;  %1315 = vmatprep.subr.bf16.mxu0 %v1314_v17  ;;  %v763_v13 = vld [vmem:[#allocation7 + $0x3d0] sm:$0xff]  ;;  %v1047_v16 = vunpack.c.0.s8 %v1046_v1 }
 0x208   :  { %v1332_v15 = vpack.c.bf16 %v763_v13, %v761_v12 }
 0x20a   :  { %1253 = vmatpush1.bf16.msra.mxu1 %v1252_v23  ;;  %1317 = vmatpush1.bf16.msra.mxu0 %v1316_v24  ;;  %v1270_v23 = vpack.c.bf16 %v704_v21, %v702_v20  ;;  %v768_v24 = vld [vmem:[#allocation7 + $0x3f8] sm:$0xff] }
 0x20b   :  { %1255 = vmatprep.subr.bf16.mxu1 %v1254_v25  ;;  %1319 = vmatprep.subr.bf16.mxu0 %v1318_v29  ;;  %v701_v25 = vld [vmem:[#allocation7 + $0x1e0] sm:$0xff]  ;;  %v1334_v27 = vpack.c.bf16 %v768_v24, %v766_v22 }
 0x20c   :  { %v1272_v28 = vpack.c.bf16 %v703_v26, %v701_v25  ;;  %v765_v29 = vld [vmem:[#allocation7 + $0x3e0] sm:$0xff]  ;;  %v1050_v25 = vsub.s32 %v1047_v16, %v1726_v46 }
 0x20d   :  { %v1336_v31 = vpack.c.bf16 %v767_v30, %v765_v29 }
 0x20e   :  { %1257 = vmatpush1.bf16.msra.mxu1 %v1256_v35  ;;  %1321 = vmatpush1.bf16.msra.mxu0 %v1320_v36  ;;  %v1631_v35 = vmov 0.0  }
 0x20f   :  { %1259 = vmatprep.subr.bf16.mxu1 %v1258_v37  ;;  %1323 = vmatprep.subr.bf16.mxu0 %v1322_v47  ;;  %v1632_v37 = vmov 1.0  }
 0x212   :  { %1261 = vmatpush1.bf16.msra.mxu1 %v1260_v55  ;;  %1325 = vmatpush1.bf16.msra.mxu0 %v1324_v57 }
 0x213   :  { %1263 = vmatprep.subr.bf16.mxu1 %v1262_v58  ;;  %1327 = vmatprep.subr.bf16.mxu0 %v1326_v63 }
 0x216   :  { %1265 = vmatpush1.bf16.msra.mxu1 %v1264_v5  ;;  %1329 = vmatpush1.bf16.msra.mxu0 %v1328_v6 }
 0x217   :  { %1267 = vmatprep.subr.bf16.mxu1 %v1266_v7  ;;  %1331 = vmatprep.subr.bf16.mxu0 %v1330_v11 }
 0x21a   :  { %1269 = vmatpush1.bf16.msra.mxu1 %v1268_v14  ;;  %1333 = vmatpush1.bf16.msra.mxu0 %v1332_v15 }
 0x21b   :  { %1271 = vmatprep.subr.bf16.mxu1 %v1270_v23  ;;  %1335 = vmatprep.subr.bf16.mxu0 %v1334_v27 }
 0x21e   :  { %1273 = vmatpush1.bf16.msra.mxu1 %v1272_v28  ;;  %1337 = vmatpush1.bf16.msra.mxu0 %v1336_v31 }
 0x27e   :  { %v620_v17 = vpop.xlane.xlu0 %619 }
 0x27f   :  { %vm621_vm7 = vcmp.eq.f32.partialorder %v1765_v56, %v620_v17  ;;  %v626_v54 = vcvt.f32.s32 %v620_v17 }
 0x280   :  { %v622_v19 = vsel %vm621_vm7, %v617_v18, inf }
 0x281   :  { %623 = vmin.xlane.f32.xlu1 %v622_v19  ;;  %v627_v32 = vshll.u32 %v626_v54, 16 }
 0x30e   :  { %v624_v56 = vpop.xlane.xlu1 %623 }
 0x30f   :  { %v625_v33 = vcvt.f32.s32 %v624_v56 }
 0x311   :  { %v628_v34 = vadd.s32 %v627_v32, %v625_v33 }
 0x313   :  { %vm630_vm9 = vcmp.eq.s32.totalorder %v1750_v42, %v628_v34  ;;  %vm632_vm10 = vcmp.eq.s32.totalorder %v1756_v44, %v628_v34  ;;  %vm629_vm11 = vcmp.eq.s32.totalorder %v1747_v41, %v628_v34  ;;  %vm631_vm12 = vcmp.eq.s32.totalorder %v1753_v43, %v628_v34 }
 0x314   :  { %v1201_v36 = vsel %vm630_vm9, 1.0, %v1631_v35  ;;  %1204 = vmatprep.mubr.msk.f32.mxu1 %vm630_vm9, %v1632_v37  ;;  %v1203_v38 = vsel %vm632_vm10, 1.0, %v1631_v35  ;;  %1206 = vmatprep.mubr.msk.f32.mxu0 %vm632_vm10, %v1632_v37  ;;  %v1200_v39 = vsel %vm629_vm11, 1.0, %v1631_v35  ;;  %v1202_v45 = vsel %vm631_vm12, 1.0, %v1631_v35 }
 0x315   :  { %v1012_v47 = vsel %vm992_vm8, %v1201_v36, 0.0  ;;  %v1014_v42 = vsel %vm992_vm8, %v1203_v38, 0.0  ;;  %1205 = vmatmul.mubr.msk.f32.vlgmr.msra.gmra.mrb[4].mxu1 %vm629_vm11, %v1632_v37  ;;  %v915_v44 = vcombine.low %v1200_v39, %v1201_v36  ;;  %v916_v48 = vcombine.high %v1200_v39, %v1201_v36  ;;  %1207 = vmatmul.mubr.msk.f32.vlgmr.msra.gmra.mrb[4].mxu0 %vm631_vm12, %v1632_v37 }
 0x316   :  { %v1021_v41 = vrot.slane %v1012_v47, 4  ;;  %v1033_v43 = vrot.slane %v1014_v42, 4  ;;  %v1011_v49 = vsel %vm992_vm8, %v1200_v39, 0.0  ;;  %v917_v50 = vcombine.low %v1202_v45, %v1203_v38 }
 0x317   :  { %v925_v51 = vrot.slane %v915_v44, %v1729_v52  ;;  %v932_v53 = vrot.slane %v916_v48, %v1729_v52  ;;  %v1015_v55 = vrot.slane %v1011_v49, 4  ;;  %v918_v57 = vcombine.high %v1202_v45, %v1203_v38 }
 0x318   :  { %v1022_v58 = vadd.f32 %v1021_v41, %v1012_v47  ;;  %v1034_v59 = vadd.f32 %v1033_v43, %v1014_v42  ;;  %v939_v61 = vrot.slane %v917_v50, %v1729_v52  ;;  %v1013_v62 = vsel %vm992_vm8, %v1202_v45, 0.0 }
 0x319   :  { %v1016_v63 = vadd.f32 %v1015_v55, %v1011_v49  ;;  %v946_v2 = vrot.slane %v918_v57, %v1729_v52  ;;  %v1027_v3 = vrot.slane %v1013_v62, 4 }
 0x31a   :  { %v1023_v4 = vrot.slane %v1022_v58, 2  ;;  %v1035_v5 = vrot.slane %v1034_v59, 2  ;;  %v947_v6 = vcombine.low %v925_v51, %v939_v61  ;;  %v948_v7 = vcombine.high %v925_v51, %v939_v61 }
 0x31b   :  { %v1017_v9 = vrot.slane %v1016_v63, 2  ;;  %v949_v10 = vcombine.low %v932_v53, %v946_v2  ;;  %v950_v11 = vcombine.high %v932_v53, %v946_v2  ;;  %v1028_v12 = vadd.f32 %v1027_v3, %v1013_v62 }
 0x31c   :  { %v1024_v13 = vadd.f32 %v1023_v4, %v1022_v58  ;;  %v1036_v14 = vadd.f32 %v1035_v5, %v1034_v59  ;;  %955 = vst [vmem:[#allocation8] sm:$0xff] %v947_v6  ;;  %956 = vst [vmem:[#allocation8 + $0x8] sm:$0xff] %v948_v7 }
 0x31d   :  { %v1018_v15 = vadd.f32 %v1017_v9, %v1016_v63  ;;  %957 = vst [vmem:[#allocation8 + $0x10] sm:$0xff] %v949_v10  ;;  %958 = vst [vmem:[#allocation8 + $0x18] sm:$0xff] %v950_v11  ;;  %v1029_v17 = vrot.slane %v1028_v12, 2 }
 0x31e   :  { %v1025_v18 = vrot.slane %v1024_v13, 1  ;;  %v1037_v19 = vrot.slane %v1036_v14, 1 }
 0x31f   :  { %v1019_v20 = vrot.slane %v1018_v15, 1  ;;  %v1030_v21 = vadd.f32 %v1029_v17, %v1028_v12 }
 0x320   :  { %v1026_v22 = vadd.f32 %v1025_v18, %v1024_v13  ;;  %v1038_v23 = vadd.f32 %v1037_v19, %v1036_v14 }
 0x321   :  { %v1020_v24 = vadd.f32 %v1019_v20, %v1018_v15  ;;  %v1031_v26 = vrot.slane %v1030_v21, 1 }
 0x323   :  { %v1043_v27 = vcombine.low %v1020_v24, %v1026_v22  ;;  %v1032_v28 = vadd.f32 %v1031_v26, %v1030_v21 }
 0x325   :  { %v1051_v29 = vrot.slane %v1043_v27, %v1050_v25  ;;  %v1044_v30 = vcombine.low %v1032_v28, %v1038_v23 }
 0x327   :  { %v1058_v31 = vrot.slane %v1044_v30, %v1050_v25 }
 0x329   :  { %v1059_v54 = vcombine.low %v1051_v29, %v1058_v31 }
 0x32b   :  { %v1066_v56 = vrot.slane %v1059_v54, %v1050_v25 }
 0x32d   :  { %1072 = vst.msk [vmem:[#allocation11] sm:$0xf] %vm1070_vm13, %v1066_v56 }
 0x3e8   :  { %v835_v32 = vpop.f32.mrb[4].mxu1  ;;  %v906_v33 = vpop.f32.mrb[4].mxu0 }
 0x3e9   :  { %v907_v34 = vadd.f32 %v906_v33, %v835_v32  ;;  %v837_v35 = vpop.f32.mrb[5].mxu1  ;;  %v908_v36 = vpop.f32.mrb[5].mxu0 }
 0x3ea   :  { %v909_v37 = vadd.f32 %v908_v36, %v837_v35 }
 0x3eb   :  { %v993_v38 = vsub.f32 %v907_v34, %v1735_v8 }
 0x3ec   :  { %v961_v39 = vcombine.low %v907_v34, %v909_v37  ;;  %v962_v45 = vcombine.high %v907_v34, %v909_v37  ;;  %v994_v47 = vsub.f32 %v909_v37, %v1731_v60 }
 0x3ed   :  { %v997_v42 = vsel %vm992_vm8, %v993_v38, 0.0 }
 0x3ee   :  { %v969_v44 = vrot.slane %v961_v39, %v1729_v52  ;;  %v976_v40 = vrot.slane %v962_v45, %v1729_v52  ;;  %1208 = vst.sshfl [vmem:[#allocation9] sm:$0x33 pattern:$0x76325410] %v961_v39  ;;  %v998_v48 = vsel %vm992_vm8, %v994_v47, 0.0  ;;  %v999_v41 = vmul.f32 %v997_v42, %v997_v42 }
 0x3ef   :  { %1209 = vst.sshfl [vmem:[#allocation9 + $0x8] sm:$0x33 pattern:$0x76325410] %v962_v45  ;;  %v1000_v43 = vmul.f32 %v998_v48, %v998_v48 }
 0x3f0   :  { %v977_v49 = vcombine.high %v969_v44, %v969_v44  ;;  %v978_v8 = vcombine.high %v976_v40, %v976_v40 }
 0x3f1   :  { %v1001_v50 = vadd.f32 %v1000_v43, %v999_v41 }
 0x3f2   :  { %984 = vst [vmem:[#allocation9 + $0x4] sm:$0xf] %v977_v49  ;;  %986 = vst [vmem:[#allocation9 + $0xc] sm:$0xf] %v978_v8 }
 0x3f3   :  { %1002 = vadd.xlane.f32.xlu1 %v1001_v50 }
 0x480   :  { %v1003_v60 = vpop.xlane.xlu1 %1002 }
 0x481   :  { %v1004_v51 = vrot.slane %v1003_v60, 4 }
 0x483   :  { %v1005_v53 = vadd.f32 %v1004_v51, %v1003_v60 }
 0x485   :  { %v1006_v55 = vrot.slane %v1005_v53, 2 }
 0x487   :  { %v1007_v57 = vadd.f32 %v1006_v55, %v1005_v53 }
 0x489   :  { %v1008_v58 = vrot.slane %v1007_v57, 1 }
 0x48b   :  { %v1009_v52 = vadd.f32 %v1008_v58, %v1007_v57 }
 0x48d   :  { %1340 = vpush %v1009_v52 }
 0x4be   :  { %s1341_s3 = spop %1340 }
 0x4bf   :  { %v1073_v59 = vstv %s1341_s3 }
 0x4c0   :  { %1074 = vst [vmem:[#allocation12] sm:$0x1] %v1073_v59 }
 0x4c1   :  { %1079 = vsyncadd [#allocation4], 384  ;;  %s1634_s12 = smov [#allocation8]  }
 0x4c2   :  { %s1080_s19 = sshll.u32 %s1634_s12, 4  ;;  %s1081_s19 = int_to_ptr.vmem [resolvable:$true] %s1080_s19 }
 0x4c3   :  { %s1525_s20 = scalar_lea.vmem %s1081_s19, 128  ;;  %s1529_s21 = scalar_lea.vmem %s1081_s19, 512 }
 0x4c4   :  { %p1526_p10 = scmp.ne.s32.totalorder %s1081_s19, %s1525_s20  ;;  %p1530_p11 = scmp.lt.s32.totalorder %s1081_s19, %s1081_s19 }
 0x4c5   :  { %p1531_p12 = scmp.lt.s32.totalorder %s1529_s21, %s1525_s20 }
 0x4c7   :  { %p1532_p13 = por %p1531_p12, %p1530_p11 }
 0x4c9   :  { %p1533_p0 = pnand %p1532_p13, %p1526_p10 }
 0x4cb   :  { %1536 = shalt.err (!%p1533_p0)
}
 0x4cc   :  { %s1537_s24 = scalar_lea.hbm %s1852_s4, 128 }
 0x4cd   :  { %p1538_p1 = scmp.ne.s32.totalorder %s1852_s4, %s1537_s24  ;;  %p1541_p2 = scmp.lt.u32.totalorder %s1537_s24, %s1852_s4 }
 0x4cf   :  { %p1543_p3 = pnand %p1541_p2, %p1538_p1 }
 0x4d1   :  { %1546 = shalt.err (!%p1543_p3)
}
 0x4d2   :  { %s1635_s30 = smov 128   ;;  %s1636_s8 = smov 8  }
 0x4d3   :  { %1086 = dma.vmem_to_hbm [thread:$0]  %s1081_s19, 128, %s1852_s4, [#allocation4], %s1635_s30, %s1635_s30, %s1636_s8  }
 0x4d4   :  { %1091 = vsyncadd [#allocation10], 192  ;;  %s1637_s13 = smov [#allocation9]   ;;  %s1638_s15 = smov [#allocation11]  }
 0x4d5   :  { %s1092_s14 = sshll.u32 %s1637_s13, 4  ;;  %s1105_s17 = sshll.u32 %s1638_s15, 4  ;;  %s1093_s14 = int_to_ptr.vmem [resolvable:$true] %s1092_s14  ;;  %s1106_s17 = int_to_ptr.vmem [resolvable:$true] %s1105_s17 }
 0x4d6   :  { %s1547_s18 = scalar_lea.vmem %s1093_s14, 64  ;;  %s1551_s0 = scalar_lea.vmem %s1093_s14, 256 }
 0x4d7   :  { %p1548_p4 = scmp.ne.s32.totalorder %s1093_s14, %s1547_s18  ;;  %p1552_p5 = scmp.lt.s32.totalorder %s1093_s14, %s1093_s14 }
 0x4d8   :  { %p1553_p6 = scmp.lt.s32.totalorder %s1551_s0, %s1547_s18 }
 0x4da   :  { %p1554_p7 = por %p1553_p6, %p1552_p5 }
 0x4dc   :  { %p1555_p8 = pnand %p1554_p7, %p1548_p4 }
 0x4de   :  { %1558 = shalt.err (!%p1555_p8)
}
 0x4df   :  { %s1559_s11 = scalar_lea.hbm %s1853_s5, 64 }
 0x4e0   :  { %p1560_p9 = scmp.ne.s32.totalorder %s1853_s5, %s1559_s11  ;;  %p1563_p10 = scmp.lt.u32.totalorder %s1559_s11, %s1853_s5 }
 0x4e2   :  { %p1565_p11 = pnand %p1563_p10, %p1560_p9 }
 0x4e4   :  { %1568 = shalt.err (!%p1565_p11)
}
 0x4e5   :  { %1098 = dma.vmem_to_hbm [thread:$0]  %s1093_s14, 64, %s1853_s5, [#allocation10], %s1627_s25, %s1627_s25, %s1628_s26  }
 0x4e6   :  { %s1569_s22 = scalar_lea.vmem %s1106_s17, 64  ;;  %p1574_p13 = scmp.lt.s32.totalorder %s1106_s17, %s1106_s17 }
 0x4e7   :  { %p1570_p12 = scmp.ne.s32.totalorder %s1106_s17, %s1569_s22  ;;  %p1575_p0 = scmp.lt.s32.totalorder %s1569_s22, %s1569_s22 }
 0x4e9   :  { %p1576_p1 = por %p1575_p0, %p1574_p13 }
 0x4eb   :  { %p1577_p2 = pnand %p1576_p1, %p1570_p12 }
 0x4ed   :  { %1580 = shalt.err (!%p1577_p2)
}
 0x4ee   :  { %s1581_s1 = scalar_lea.hbm %s1854_s6, 64 }
 0x4ef   :  { %p1582_p3 = scmp.ne.s32.totalorder %s1854_s6, %s1581_s1  ;;  %p1585_p4 = scmp.lt.u32.totalorder %s1581_s1, %s1854_s6 }
 0x4f1   :  { %p1587_p5 = pnand %p1585_p4, %p1582_p3 }
 0x4f3   :  { %1590 = shalt.err (!%p1587_p5)
}
 0x4f4   :  { %1108 = dma.vmem_to_hbm [thread:$0]  %s1106_s17, 64, %s1854_s6, [#allocation10]  }
 0x4f5   :  { %s1639_s26 = smov [#allocation12]  }
 0x4f6   :  { %s1115_s8 = sshll.u32 %s1639_s26, 4  ;;  %s1116_s8 = int_to_ptr.vmem [resolvable:$true] %s1115_s8 }
 0x4f7   :  { %s1591_s9 = scalar_lea.vmem %s1116_s8, 16  ;;  %s1595_s10 = scalar_lea.vmem %s1116_s8, 32 }
 0x4f8   :  { %p1592_p6 = scmp.ne.s32.totalorder %s1116_s8, %s1591_s9  ;;  %p1596_p7 = scmp.lt.s32.totalorder %s1116_s8, %s1116_s8 }
 0x4f9   :  { %p1597_p8 = scmp.lt.s32.totalorder %s1595_s10, %s1591_s9 }
 0x4fb   :  { %p1598_p9 = por %p1597_p8, %p1596_p7 }
 0x4fd   :  { %p1599_p10 = pnand %p1598_p9, %p1592_p6 }
 0x4ff   :  { %1602 = shalt.err (!%p1599_p10)
}
 0x500   :  { %s1603_s15 = scalar_lea.hbm %s1855_s7, 16 }
 0x501   :  { %p1604_p11 = scmp.ne.s32.totalorder %s1855_s7, %s1603_s15  ;;  %p1607_p12 = scmp.lt.u32.totalorder %s1603_s15, %s1855_s7 }
 0x503   :  { %p1609_p13 = pnand %p1607_p12, %p1604_p11 }
 0x505   :  { %1612 = shalt.err (!%p1609_p13)
}
 0x506   :  { %1118 = dma.vmem_to_hbm [thread:$0]  %s1116_s8, 16, %s1855_s7, [#allocation13]  }
 0x507   :  { %1617 = dma.done.wait [#allocation4], 512  }
 0x508   :  { %1618 = vsyncadd [#allocation4], 4294966784 }
 0x509   :  { %1619 = dma.done.wait [#allocation10], 320  }
 0x50a   :  { %1620 = vsyncadd [#allocation10], 4294966976 }
 0x50b   :  { %1621 = dma.done.wait [#allocation13], 16  }
 0x50c   :  { %1622 = vsyncadd [#allocation13], 4294967280 }
 0x50d   :  { %1131 = vsyncpa [#allocation3], 1 }
 0x50e   :  { %1132 = vsyncpa [#allocation6], 1 }
 0x50f   :  { %1133 = vsyncpa [#allocation4], 1 }
 0x510   :  { %1134 = vsyncpa [#allocation10], 1 }
 0x511   :  { %1135 = vsyncpa [#allocation13], 1 }

</bundles_post_ra>
